<compile_context>
chip_gen: v5e
topology: v5e:2x2
jax: 0.10.0
libtpu: 0.0.40
codegen_flags: <defaults>
</compile_context>

<pallas_src>
import functools

import numpy as np
import jax
import jax.numpy as jnp
from jax.experimental import pallas as pl
from jax.experimental.pallas import tpu as pltpu


# ---------------------------------------------------------------------------
# Kernel 1: scaled DropBlock keep-mask, shape (N, H, W), computed once.
# ---------------------------------------------------------------------------
def _mask_kernel(gamma_ref, u_ref, m_ref, padw_ref, padh_ref,
                 *, block_size, n, h, w):
    k = block_size
    pad = k // 2
    gamma = gamma_ref[0]

    # Bernoulli(gamma) seed mask over (N, H, W): 1 = block seed.
    seeds = (u_ref[...] < gamma).astype(jnp.float32)

    # Separable max-pool (kernel=k, stride=1, padding=k//2), cropped to (H, W).
    # Pool along W using a zero-padded scratch buffer.
    padw_ref[...] = jnp.zeros_like(padw_ref)            # (n, h, w + k - 1)
    padw_ref[:, :, pad:pad + w] = seeds
    pooled_w = padw_ref[:, :, 0:w]
    for d in range(1, k):
        pooled_w = jnp.maximum(pooled_w, padw_ref[:, :, d:d + w])
    # Pool along H.
    padh_ref[...] = jnp.zeros_like(padh_ref)            # (n, h + k - 1, w)
    padh_ref[:, pad:pad + h, :] = pooled_w
    block = padh_ref[:, 0:h, :]
    for d in range(1, k):
        block = jnp.maximum(block, padh_ref[:, d:d + h, :])

    keep = 1.0 - block                                  # 1 = keep, 0 = dropped
    cnt = jnp.sum(keep)
    numel = jnp.float32(n * h * w)
    # Guard cnt == 0 (everything dropped) to avoid inf/NaN output.
    scale = jnp.where(cnt > 0.0, numel / cnt, jnp.float32(0.0))
    m_ref[...] = keep * scale                           # fold scale into mask


# ---------------------------------------------------------------------------
# Kernel 2: lane-dense masked multiply over (N, C, H*W) tiles.
# ---------------------------------------------------------------------------
def _mul_kernel(x_ref, m_ref, o_ref):
    # x_ref: (1, TC, HW) input tile; m_ref: (1, 1, HW) scaled keep-mask.
    # Implicit broadcast over the channel (sublane) axis; single VPU multiply.
    o_ref[...] = (x_ref[...] * m_ref[...].astype(x_ref.dtype)).astype(o_ref.dtype)


def _pick_channel_tile(c, hw, itemsize, budget_bytes=4 << 20):
    """Largest channel tile that divides C, keeps a (tc, HW) block under the
    budget, and satisfies the (8, 128) sublane rule (tc % 8 == 0 or tc == C)."""
    if c * hw * itemsize <= budget_bytes:
        return c
    best = 0
    t = 8
    while t <= c:
        if c % t == 0 and t * hw * itemsize <= budget_bytes:
            best = t
        t += 8
    return best if best > 0 else c


@functools.partial(jax.jit, static_argnames=("block_size",))
def dropblock2d_pallas(x, key, gamma, *, block_size):
    n, c, h, w = x.shape
    hw = h * w
    k = block_size
    pad_extra = k - 1

    # Uniforms for the Bernoulli draw (host-side jax.random, thresholded in-kernel).
    u = jax.random.uniform(key, (n, h, w), dtype=jnp.float32)

    # --- mask kernel: one scaled keep-mask per sample, shared across channels.
    mask = pl.pallas_call(
        functools.partial(_mask_kernel, block_size=k, n=n, h=h, w=w),
        out_shape=jax.ShapeDtypeStruct((n, h, w), jnp.float32),
        in_specs=[
            pl.BlockSpec(memory_space=pltpu.MemorySpace.SMEM),   # gamma (1,) f32
            pl.BlockSpec(memory_space=pltpu.MemorySpace.VMEM),   # u, whole array
        ],
        out_specs=pl.BlockSpec(memory_space=pltpu.MemorySpace.VMEM),
        scratch_shapes=[
            pltpu.VMEM((n, h, w + pad_extra), jnp.float32),      # W-pool pad buf
            pltpu.VMEM((n, h + pad_extra, w), jnp.float32),      # H-pool pad buf
        ],
    )(gamma, u)

    # --- multiply kernel: lane-dense (last dim = H*W, multiple of 128 for the
    # demo shape) tiled over (N, C/TC) with both axes parallel (megacore-ready).
    x3 = x.reshape(n, c, hw)
    m3 = mask.reshape(n, 1, hw)
    tc = _pick_channel_tile(c, hw, x.dtype.itemsize)

    out = pl.pallas_call(
        _mul_kernel,
        out_shape=jax.ShapeDtypeStruct((n, c, hw), x.dtype),
        grid=(n, c // tc),
        in_specs=[
            pl.BlockSpec((1, tc, hw), lambda i, j: (i, j, 0)),   # x tile
            pl.BlockSpec((1, 1, hw), lambda i, j: (i, 0, 0)),    # per-sample mask
        ],
        out_specs=pl.BlockSpec((1, tc, hw), lambda i, j: (i, j, 0)),
        compiler_params=pltpu.CompilerParams(
            dimension_semantics=("parallel", "parallel"),
            vmem_limit_bytes=32 << 20),
    )(x3, m3)
    return out.reshape(n, c, h, w)


class DropBlock2D:
    """DropBlock2D whose forward (mask expansion + renorm + masked multiply)
    runs in Pallas kernels.  Mask is per-sample over (H, W), shared across C."""

    def __init__(self, drop_prob, block_size, seed=0):
        self.drop_prob = float(drop_prob)
        self.block_size = int(block_size)
        self.training = True
        self._key = jax.random.PRNGKey(seed)

    def __call__(self, x):
        if (not self.training) or self.drop_prob == 0.0:
            return x
        self._key, sub = jax.random.split(self._key)
        gamma = jnp.array([self.drop_prob / (self.block_size ** 2)],
                          dtype=jnp.float32)
        return dropblock2d_pallas(x, sub, gamma, block_size=self.block_size)


class LinearScheduler:
    """JAX port of the PyTorch LinearScheduler: forward(x) = dropblock(x)."""

    def __init__(self, dropblock, start_value, stop_value, nr_steps):
        self.dropblock = dropblock
        self.i = 0
        self.drop_values = np.linspace(start=start_value, stop=stop_value,
                                       num=int(nr_steps))

    def forward(self, x):
        return self.dropblock(x)

    __call__ = forward

    def step(self):
        # Host-side bookkeeping only (matches the PyTorch module).
        if self.i < len(self.drop_values):
            self.dropblock.drop_prob = float(self.drop_values[self.i])
        self.i += 1


if __name__ == "__main__":
    key = jax.random.PRNGKey(0)
    x = jax.random.normal(key, (2, 4, 16, 16), dtype=jnp.float32)

    scheduler = LinearScheduler(
        DropBlock2D(drop_prob=0.0, block_size=3),
        start_value=0.0, stop_value=0.25, nr_steps=5)

    # Advance the schedule so drop_prob > 0 and the kernel actually drops blocks.
    for _ in range(5):
        scheduler.step()

    out = jax.block_until_ready(scheduler(x))

    assert out.shape == x.shape and out.dtype == x.dtype
    assert bool(jnp.all(jnp.isfinite(out)))
    print("KERNEL_OK")
</pallas_src>

<mosaic_0001>
module attributes {stable_mosaic.version = 11 : i64} {
  func.func @_mul_kernel(%arg0: i32, %arg1: i32, %arg2: memref<1x4x256xf32, #tpu.memory_space<vmem>>, %arg3: memref<1x1x256xf32, #tpu.memory_space<vmem>>, %arg4: memref<1x4x256xf32, #tpu.memory_space<vmem>>) attributes {dimension_semantics = [#tpu.dimension_semantics<parallel>, #tpu.dimension_semantics<parallel>], iteration_bounds = array<i64: 2, 1>, scalar_prefetch = 0 : i64, scratch_operands = 0 : i64, tpu.core_type = #tpu.core_type<tc>, window_params = [{transform_indices = @transform_0, window_bounds = array<i64: 1, 4, 256>}, {transform_indices = @transform_1, window_bounds = array<i64: 1, 1, 256>}, {transform_indices = @transform_2, window_bounds = array<i64: 1, 4, 256>}]} {
    %c0 = arith.constant 0 : index
    %c0_0 = arith.constant 0 : index
    %c0_1 = arith.constant 0 : index
    %0 = vector.load %arg2[%c0, %c0_0, %c0_1] : memref<1x4x256xf32, #tpu.memory_space<vmem>>, vector<1x4x256xf32>
    %c0_2 = arith.constant 0 : index
    %c0_3 = arith.constant 0 : index
    %c0_4 = arith.constant 0 : index
    %1 = vector.load %arg3[%c0_2, %c0_3, %c0_4] : memref<1x1x256xf32, #tpu.memory_space<vmem>>, vector<1x1x256xf32>
    %2 = vector.broadcast %1 : vector<1x1x256xf32> to vector<1x4x256xf32>
    %3 = arith.mulf %0, %2 : vector<1x4x256xf32>
    %c0_5 = arith.constant 0 : index
    %c0_6 = arith.constant 0 : index
    %c0_7 = arith.constant 0 : index
    %4 = vector.load %arg4[%c0_5, %c0_6, %c0_7] : memref<1x4x256xf32, #tpu.memory_space<vmem>>, vector<1x4x256xf32>
    tpu.vector_store %arg4[%c0_5, %c0_6, %c0_7], %3 {strides = array<i32>} : memref<1x4x256xf32, #tpu.memory_space<vmem>>, vector<1x4x256xf32>,
    return
  }
  func.func @transform_0(%arg0: i32, %arg1: i32) -> (i32, i32, i32) {
    %c0_i32 = arith.constant 0 : i32
    %c0_i32_0 = arith.constant 0 : i32
    return %arg0, %arg1, %c0_i32 : i32, i32, i32
  }
  func.func @transform_1(%arg0: i32, %arg1: i32) -> (i32, i32, i32) {
    %c0_i32 = arith.constant 0 : i32
    %c0_i32_0 = arith.constant 0 : i32
    %c0_i32_1 = arith.constant 0 : i32
    return %arg0, %c0_i32, %c0_i32_0 : i32, i32, i32
  }
  func.func @transform_2(%arg0: i32, %arg1: i32) -> (i32, i32, i32) {
    %c0_i32 = arith.constant 0 : i32
    %c0_i32_0 = arith.constant 0 : i32
    return %arg0, %arg1, %c0_i32 : i32, i32, i32
  }
}

module attributes {stable_mosaic.version = 11 : i64} {
  func.func @_mask_kernel(%arg0: memref<1xf32, #tpu.memory_space<smem>>, %arg1: memref<2x16x16xf32, #tpu.memory_space<vmem>>, %arg2: memref<2x16x16xf32, #tpu.memory_space<vmem>>, %arg3: memref<2x16x18xf32, #tpu.memory_space<vmem>>, %arg4: memref<2x18x16xf32, #tpu.memory_space<vmem>>) attributes {dimension_semantics = [], scalar_prefetch = 0 : i64, scratch_operands = 2 : i64, tpu.core_type = #tpu.core_type<tc>} {
    %c0 = arith.constant 0 : index
    %0 = memref.load %arg0[%c0] : memref<1xf32, #tpu.memory_space<smem>>
    %c0_0 = arith.constant 0 : index
    %c0_1 = arith.constant 0 : index
    %c0_2 = arith.constant 0 : index
    %1 = vector.load %arg1[%c0_0, %c0_1, %c0_2] : memref<2x16x16xf32, #tpu.memory_space<vmem>>, vector<2x16x16xf32>
    %2 = vector.broadcast %0 : f32 to vector<2x16x16xf32>
    %3 = arith.cmpf olt, %1, %2 : vector<2x16x16xf32>
    %4 = arith.extui %3 : vector<2x16x16xi1> to vector<2x16x16xi32>
    %5 = arith.sitofp %4 : vector<2x16x16xi32> to vector<2x16x16xf32>
    %cst = arith.constant 0.000000e+00 : f32
    %6 = vector.broadcast %cst : f32 to vector<2x16x18xf32>
    %c0_3 = arith.constant 0 : index
    %c0_4 = arith.constant 0 : index
    %c0_5 = arith.constant 0 : index
    %7 = vector.load %arg3[%c0_3, %c0_4, %c0_5] : memref<2x16x18xf32, #tpu.memory_space<vmem>>, vector<2x16x18xf32>
    tpu.vector_store %arg3[%c0_3, %c0_4, %c0_5], %6 {strides = array<i32>} : memref<2x16x18xf32, #tpu.memory_space<vmem>>, vector<2x16x18xf32>,
    %c0_6 = arith.constant 0 : index
    %c0_7 = arith.constant 0 : index
    %c1 = arith.constant 1 : index
    %8 = vector.load %arg3[%c0_6, %c0_7, %c1] : memref<2x16x18xf32, #tpu.memory_space<vmem>>, vector<2x16x16xf32>
    tpu.vector_store %arg3[%c0_6, %c0_7, %c1], %5 {strides = array<i32>} : memref<2x16x18xf32, #tpu.memory_space<vmem>>, vector<2x16x16xf32>,
    %c0_8 = arith.constant 0 : index
    %c0_9 = arith.constant 0 : index
    %c0_10 = arith.constant 0 : index
    %9 = vector.load %arg3[%c0_8, %c0_9, %c0_10] : memref<2x16x18xf32, #tpu.memory_space<vmem>>, vector<2x16x16xf32>
    %c0_11 = arith.constant 0 : index
    %c0_12 = arith.constant 0 : index
    %c1_13 = arith.constant 1 : index
    %10 = vector.load %arg3[%c0_11, %c0_12, %c1_13] : memref<2x16x18xf32, #tpu.memory_space<vmem>>, vector<2x16x16xf32>
    %11 = arith.maximumf %9, %10 : vector<2x16x16xf32>
    %c0_14 = arith.constant 0 : index
    %c0_15 = arith.constant 0 : index
    %c2 = arith.constant 2 : index
    %12 = vector.load %arg3[%c0_14, %c0_15, %c2] : memref<2x16x18xf32, #tpu.memory_space<vmem>>, vector<2x16x16xf32>
    %13 = arith.maximumf %11, %12 : vector<2x16x16xf32>
    %cst_16 = arith.constant 0.000000e+00 : f32
    %14 = vector.broadcast %cst_16 : f32 to vector<2x18x16xf32>
    %c0_17 = arith.constant 0 : index
    %c0_18 = arith.constant 0 : index
    %c0_19 = arith.constant 0 : index
    %15 = vector.load %arg4[%c0_17, %c0_18, %c0_19] : memref<2x18x16xf32, #tpu.memory_space<vmem>>, vector<2x18x16xf32>
    tpu.vector_store %arg4[%c0_17, %c0_18, %c0_19], %14 {strides = array<i32>} : memref<2x18x16xf32, #tpu.memory_space<vmem>>, vector<2x18x16xf32>,
    %c0_20 = arith.constant 0 : index
    %c1_21 = arith.constant 1 : index
    %c0_22 = arith.constant 0 : index
    %16 = vector.load %arg4[%c0_20, %c1_21, %c0_22] : memref<2x18x16xf32, #tpu.memory_space<vmem>>, vector<2x16x16xf32>
    tpu.vector_store %arg4[%c0_20, %c1_21, %c0_22], %13 {strides = array<i32>} : memref<2x18x16xf32, #tpu.memory_space<vmem>>, vector<2x16x16xf32>,
    %c0_23 = arith.constant 0 : index
    %c0_24 = arith.constant 0 : index
    %c0_25 = arith.constant 0 : index
    %17 = vector.load %arg4[%c0_23, %c0_24, %c0_25] : memref<2x18x16xf32, #tpu.memory_space<vmem>>, vector<2x16x16xf32>
    %c0_26 = arith.constant 0 : index
    %c1_27 = arith.constant 1 : index
    %c0_28 = arith.constant 0 : index
    %18 = vector.load %arg4[%c0_26, %c1_27, %c0_28] : memref<2x18x16xf32, #tpu.memory_space<vmem>>, vector<2x16x16xf32>
    %19 = arith.maximumf %17, %18 : vector<2x16x16xf32>
    %c0_29 = arith.constant 0 : index
    %c2_30 = arith.constant 2 : index
    %c0_31 = arith.constant 0 : index
    %20 = vector.load %arg4[%c0_29, %c2_30, %c0_31] : memref<2x18x16xf32, #tpu.memory_space<vmem>>, vector<2x16x16xf32>
    %21 = arith.maximumf %19, %20 : vector<2x16x16xf32>
    %cst_32 = arith.constant 1.000000e+00 : f32
    %22 = vector.broadcast %cst_32 : f32 to vector<2x16x16xf32>
    %23 = arith.subf %22, %21 : vector<2x16x16xf32>
    %24 = vector.shape_cast %23 : vector<2x16x16xf32> to vector<1x2x16x16xf32>
    %cst_33 = arith.constant dense<0.000000e+00> : vector<1xf32>
    %25 = vector.multi_reduction <add>, %24, %cst_33 [1, 2, 3] : vector<1x2x16x16xf32> to vector<1xf32>
    %26 = vector.shape_cast %25 : vector<1xf32> to vector<1x1x1x1xf32>
    %27 = vector.extract %26[0, 0, 0, 0] : f32 from vector<1x1x1x1xf32>
    %cst_34 = arith.constant 0.000000e+00 : f32
    %28 = arith.cmpf ogt, %27, %cst_34 : f32
    %cst_35 = arith.constant 5.120000e+02 : f32
    %29 = arith.divf %cst_35, %27 : f32
    %cst_36 = arith.constant 0.000000e+00 : f32
    %30 = arith.select %28, %29, %cst_36 : f32
    %31 = vector.broadcast %30 : f32 to vector<2x16x16xf32>
    %32 = arith.mulf %23, %31 : vector<2x16x16xf32>
    %c0_37 = arith.constant 0 : index
    %c0_38 = arith.constant 0 : index
    %c0_39 = arith.constant 0 : index
    %33 = vector.load %arg2[%c0_37, %c0_38, %c0_39] : memref<2x16x16xf32, #tpu.memory_space<vmem>>, vector<2x16x16xf32>
    tpu.vector_store %arg2[%c0_37, %c0_38, %c0_39], %32 {strides = array<i32>} : memref<2x16x16xf32, #tpu.memory_space<vmem>>, vector<2x16x16xf32>,
    return
  }
}

</mosaic_0001>

<bundles_post_ra>
// kernel: dropblock2d_pallas.3
= control target key start
LH: loop header
LB: loop body
LE: loop exit
PB: predicated region body
PF: predicated region fallthrough
CT: control target
= control target key end

     0   :  { %s389_s9 = smov 0   ;;  %s391_s10 = smov 0   ;;  %s418_s0 = inlined_call_operand.vmem [shape: f32[2,4,256], index: 0, kind: input, shape index: {}]   ;;  %s419_s1 = inlined_call_operand.vmem [shape: f32[2,1,256], index: 1, kind: input, shape index: {}]   ;;  %s420_s2 = inlined_call_operand.vmem [shape: f32[2,4,256], index: 2, kind: output, shape index: {}]  }
   0x1   :  { %s393_s11 = smov 0  }
   0x2 LB: > { %s24_s12 = sadd.s32 1, %s368_s10  ;;  %p316_p0 = scmp.ge.s32.totalorder %s372_s11, 1  ;;  %s372_s11 = sphi %s393_s11, %s12_s11   ;;  %s368_s10 = sphi %s391_s10, %s422_s10   ;;  %s364_s9 = sphi %s389_s9, %s421_s9  }
   0x3   : > { %p26_p1 = scmp.ge.s32.totalorder %s24_s12, 2  ;;  %p141_p2 = scmp.lt.s32.totalorder %s372_s11, 3 }
   0x5   : > { %s424_s12 = smov (%p26_p1, %s24_s12), 0  ;;  %p142_p3 = pnand %p316_p0, %p141_p2 }
   0x6   : > { %p175_p4 = scmp.lt.s32.totalorder (!%p142_p3), %s364_s9, 1 }
   0x7   : > { %145 = sbr.rel (%p142_p3) target bundleno = 24 (0x18), region = 28 }
   0xc   : > { %s426_s9 = smov (!%p175_p4, %s364_s9), 1  ;;  %vm203_vm0 = vcmask 1043456  }
   0xd   : > { %s324_s13 = sshll.u32 %s426_s9, 3  ;;  %s319_s14 = sshll.u32 %s426_s9, 1 }
   0xe   : > { %s187_s17 = scalar_lea.vmem %s419_s1, %s319_s14  ;;  %s183_s20 = scalar_lea.vmem %s418_s0, %s324_s13 }
   0xf   : > { %v198_v0 = vld [vmem:[%s187_s17] sm:$0x3]  ;;  %s196_s23 = scalar_lea.vmem %s420_s2, %s324_s13 }
  0x10   : > { %v200_v1 = vperm.slane %v198_v0, 0  ;;  %v201_v2 = vperm.slane %v198_v0, 1  ;;  %v197_v3 = vld [vmem:[%s183_s20] sm:$0xff] }
  0x12   : > { %v202_v4 = vrot.slane %v201_v2, 4 }
  0x14   : > { %v204_v5 = vsel %vm203_vm0, %v200_v1, %v202_v4 }
  0x15   : > { %v206_v6 = vmul.f32 %v204_v5, %v197_v3 }
  0x17   : > { %207 = vst [vmem:[%s196_s23] sm:$0xff] %v206_v6 }
  0x18 PF: > { %s12_s11 = sadd.s32 1, %s372_s11   ;;  %s421_s9 = smov %s368_s10 }
  0x19   : > { %p9_p5 = scmp.ge.s32.totalorder %s12_s11, 4   ;;  %s422_s10 = smov %s424_s12 }
  0x1b   :  { %11 = sbr.rel (!%p9_p5) target bundleno = 2 (0x2), region = 61 }

// kernel: dropblock2d_pallas.2
= control target key start
LH: loop header
LB: loop body
LE: loop exit
PB: predicated region body
PF: predicated region fallthrough
CT: control target
= control target key end

     0   :  { %vm30_vm0 = vcmask 146432   ;;  %v204_v4 = vmov 0.0   ;;  %vm51_vm5 = vcmask 138248   ;;  %s207_s19 = smov 127   ;;  %vm96_vm6 = vcmask 130048   ;;  %s270_s0 = inlined_call_operand.<no memory space> [shape: f32[1], index: 0, kind: input, shape index: {}]   ;;  %s271_s1 = inlined_call_operand.vmem [shape: f32[2,16,16], index: 1, kind: input, shape index: {}]   ;;  %s272_s2 = inlined_call_operand.vmem [shape: f32[2,16,16], index: 2, kind: output, shape index: {}]  }
   0x1   :  { %v13_v0 = vld [vmem:[%s271_s1] sm:$0xff]  ;;  %v14_v1 = vld [vmem:[%s271_s1 + $0x8] sm:$0xff]  ;;  %v17_v2 = vstv %s270_s0  ;;  %v15_v3 = vld [vmem:[%s271_s1 + $0x10] sm:$0xff]  ;;  %31 = vst.msk [vmem:[#allocation2] sm:$0xff] %vm30_vm0, %v204_v4  ;;  %s205_s0 = smov 1   ;;  %vm99_vm7 = vcmask 123904  }
   0x2   :  { %vm18_vm1 = vcmp.lt.f32.partialorder %v13_v0, %v17_v2  ;;  %vm19_vm2 = vcmp.lt.f32.partialorder %v14_v1, %v17_v2  ;;  %v16_v5 = vld [vmem:[%s271_s1 + $0x18] sm:$0xff]  ;;  %32 = vst.msk [vmem:[#allocation2 + $0x8] sm:$0xff] %vm30_vm0, %v204_v4  ;;  %vm20_vm3 = vcmp.lt.f32.partialorder %v15_v3, %v17_v2  ;;  %s206_s1 = smov 126  }
   0x3   :  { %v180_v6 = vsel %vm18_vm1, 1.0, %v204_v4  ;;  %v181_v7 = vsel %vm19_vm2, 1.0, %v204_v4  ;;  %33 = vst.msk [vmem:[#allocation2 + $0x10] sm:$0xff] %vm30_vm0, %v204_v4  ;;  %vm21_vm4 = vcmp.lt.f32.partialorder %v16_v5, %v17_v2  ;;  %v182_v9 = vsel %vm20_vm3, 1.0, %v204_v4 }
   0x4   :  { %v192_v8 = vpack.i.bf16 %v181_v7, %v180_v6  ;;  %34 = vst.msk [vmem:[#allocation2 + $0x18] sm:$0xff] %vm30_vm0, %v204_v4  ;;  %v183_v10 = vsel %vm21_vm4, 1.0, %v204_v4 }
   0x5   :  { %v197_v11 = vpack.i.bf16 %v183_v10, %v182_v9  ;;  %101 = vst.msk [vmem:[#allocation3 + $0x18] sm:$0xff] %vm96_vm6, %v204_v4 }
   0x6   :  { %193 = vrot.lane.b32.xlu0 %v192_v8, %s205_s0  ;;  %102 = vst.msk [vmem:[#allocation3 + $0x20] sm:$0xff] %vm96_vm6, %v204_v4 }
   0x7   :  { %97 = vst.msk [vmem:[#allocation3] sm:$0xff] %vm96_vm6, %v204_v4 }
   0x8   :  { %98 = vst.msk [vmem:[#allocation3 + $0x8] sm:$0xff] %vm96_vm6, %v204_v4 }
   0x9   :  { %100 = vst.msk [vmem:[#allocation3 + $0x10] sm:$0x3] %vm99_vm7, %v204_v4 }
   0xa   :  { %103 = vst.msk [vmem:[#allocation3 + $0x28] sm:$0x3] %vm99_vm7, %v204_v4 }
   0xe   :  { %198 = vrot.lane.b32.xlu0 %v197_v11, %s205_s0 }
  0x78   :  { %v194_v12 = vpop.permute.xlu0 %193 }
  0x79   :  { %v196_v13 = vunpack.i.h.bf16 %v194_v12  ;;  %v195_v14 = vunpack.i.l.bf16 %v194_v12 }
  0x7b   :  { %53 = vst.msk [vmem:[#allocation2 + $0x8] sm:$0xff] %vm51_vm5, %v196_v13 }
  0x7c   :  { %52 = vst.msk [vmem:[#allocation2] sm:$0xff] %vm51_vm5, %v195_v14 }
  0x80   :  { %v199_v15 = vpop.permute.xlu0 %198 }
  0x81   :  { %v201_v16 = vunpack.i.h.bf16 %v199_v15  ;;  %v200_v17 = vunpack.i.l.bf16 %v199_v15 }
  0x82   :  { %v57_v18 = vld [vmem:[#allocation2 + $0x8] sm:$0xff] }
  0x83   :  { %55 = vst.msk [vmem:[#allocation2 + $0x18] sm:$0xff] %vm51_vm5, %v201_v16  ;;  %82 = vrot.lane.b32.xlu0 %v57_v18, %s206_s1  ;;  %v56_v19 = vld [vmem:[#allocation2] sm:$0xff] }
  0x84   :  { %54 = vst.msk [vmem:[#allocation2 + $0x10] sm:$0xff] %vm51_vm5, %v200_v17  ;;  %64 = vrot.lane.b32.xlu1 %v56_v19, %s207_s19 }
  0x8a   :  { %v59_v20 = vld [vmem:[#allocation2 + $0x18] sm:$0xff] }
  0x8b   :  { %v58_v21 = vld [vmem:[#allocation2 + $0x10] sm:$0xff]  ;;  %86 = vrot.lane.b32.xlu0 %v59_v20, %s206_s1 }
  0x8c   :  { %68 = vrot.lane.b32.xlu2 %v58_v21, %s207_s19  ;;  %66 = vrot.lane.b32.xlu1 %v57_v18, %s207_s19 }
  0x94   :  { %80 = vrot.lane.b32.xlu2 %v56_v19, %s206_s1  ;;  %70 = vrot.lane.b32.xlu1 %v59_v20, %s207_s19 }
  0x9c   :  { %84 = vrot.lane.b32.xlu2 %v58_v21, %s206_s1 }
  0xe6   :  { %v69_v22 = vpop.permute.xlu2 %68 }
  0xe7   :  { %v78_v24 = vmax.f32 %v58_v21, %v69_v22 }
  0xee   :  { %v81_v23 = vpop.permute.xlu2 %80 }
  0xf5   :  { %v83_v32 = vpop.permute.xlu0 %82 }
  0xf6   :  { %v85_v25 = vpop.permute.xlu2 %84  ;;  %v65_v26 = vpop.permute.xlu1 %64 }
  0xf7   :  { %v94_v27 = vmax.f32 %v78_v24, %v85_v25  ;;  %v76_v28 = vmax.f32 %v56_v19, %v65_v26 }
  0xf9   :  { %106 = vst.msk [vmem:[#allocation3 + $0x19] sm:$0xff] %vm96_vm6, %v94_v27  ;;  %v92_v29 = vmax.f32 %v76_v28, %v81_v23 }
  0xfb   :  { %104 = vst.msk [vmem:[#allocation3 + $0x1] sm:$0xff] %vm96_vm6, %v92_v29 }
  0xfd   :  { %v87_v36 = vpop.permute.xlu0 %86 }
  0xfe   :  { %v67_v30 = vpop.permute.xlu1 %66 }
  0xff   :  { %v77_v31 = vmax.f32 %v57_v18, %v67_v30 }
 0x100   :  { %v110_v48 = vld [vmem:[#allocation3 + $0x18] sm:$0xff] }
 0x101   :  { %v93_v33 = vmax.f32 %v77_v31, %v83_v32  ;;  %v114_v49 = vld [vmem:[#allocation3 + $0x19] sm:$0xff] }
 0x102   :  { %v108_v37 = vld [vmem:[#allocation3] sm:$0xff]  ;;  %v118_v51 = vmax.f32 %v110_v48, %v114_v49 }
 0x103   :  { %105 = vst.msk [vmem:[#allocation3 + $0x9] sm:$0xff] %vm96_vm6, %v93_v33  ;;  %v112_v38 = vld [vmem:[#allocation3 + $0x1] sm:$0xff] }
 0x104   :  { %v116_v43 = vmax.f32 %v108_v37, %v112_v38 }
 0x106   :  { %v71_v34 = vpop.permute.xlu1 %70 }
 0x107   :  { %v79_v35 = vmax.f32 %v59_v20, %v71_v34 }
 0x109   :  { %v95_v39 = vmax.f32 %v79_v35, %v87_v36 }
 0x10a   :  { %v109_v40 = vld [vmem:[#allocation3 + $0x8] sm:$0xff] }
 0x10b   :  { %v113_v41 = vld [vmem:[#allocation3 + $0x9] sm:$0xff]  ;;  %107 = vst.msk [vmem:[#allocation3 + $0x21] sm:$0xff] %vm96_vm6, %v95_v39 }
 0x10c   :  { %v120_v42 = vld [vmem:[#allocation3 + $0x2] sm:$0xff]  ;;  %v117_v44 = vmax.f32 %v109_v40, %v113_v41  ;;  %v121_v45 = vld [vmem:[#allocation3 + $0xa] sm:$0xff] }
 0x10d   :  { %v124_v46 = vmax.f32 %v116_v43, %v120_v42 }
 0x10e   :  { %v125_v47 = vmax.f32 %v117_v44, %v121_v45 }
 0x10f   :  { %v128_v52 = vsub.f32 1.0, %v124_v46 }
 0x110   :  { %v129_v50 = vsub.f32 1.0, %v125_v47 }
 0x111   :  { %v132_v62 = vsel %vm96_vm6, %v128_v52, 0.0 }
 0x112   :  { %v111_v53 = vld [vmem:[#allocation3 + $0x20] sm:$0xff]  ;;  %v133_v58 = vsel %vm96_vm6, %v129_v50, 0.0 }
 0x113   :  { %v115_v54 = vld [vmem:[#allocation3 + $0x21] sm:$0xff]  ;;  %v134_v63 = vadd.f32 %v133_v58, %v132_v62 }
 0x114   :  { %v122_v55 = vld [vmem:[#allocation3 + $0x1a] sm:$0xff]  ;;  %v119_v56 = vmax.f32 %v111_v53, %v115_v54  ;;  %v123_v59 = vld [vmem:[#allocation3 + $0x22] sm:$0xff] }
 0x115   :  { %v126_v57 = vmax.f32 %v118_v51, %v122_v55 }
 0x116   :  { %v127_v60 = vmax.f32 %v119_v56, %v123_v59 }
 0x117   :  { %v130_v61 = vsub.f32 1.0, %v126_v57 }
 0x118   :  { %v131_v0 = vsub.f32 1.0, %v127_v60 }
 0x119   :  { %v135_v1 = vsel %vm96_vm6, %v130_v61, 0.0 }
 0x11a   :  { %v136_v2 = vadd.f32 %v135_v1, %v134_v63  ;;  %v137_v3 = vsel %vm96_vm6, %v131_v0, 0.0 }
 0x11c   :  { %v138_v4 = vadd.f32 %v137_v3, %v136_v2 }
 0x11e   :  { %139 = vadd.xlane.f32.xlu1 %v138_v4 }
 0x191   :  { %v140_v5 = vpop.xlane.xlu1 %139 }
 0x192   :  { %v141_v6 = vrot.slane %v140_v5, 4 }
 0x194   :  { %v142_v7 = vadd.f32 %v141_v6, %v140_v5 }
 0x196   :  { %v143_v8 = vrot.slane %v142_v7, 2 }
 0x198   :  { %v144_v9 = vadd.f32 %v143_v8, %v142_v7 }
 0x19a   :  { %v145_v10 = vrot.slane %v144_v9, 1 }
 0x19c   :  { %v146_v11 = vadd.f32 %v145_v10, %v144_v9 }
 0x19e   :  { %184 = vpush %v146_v11 }
 0x1cf   :  { %s185_s20 = spop %184 }
 0x1d0   :  { %v149_v12 = vstv %s185_s20  ;;  %p148_p0 = scmp.gt.f32.partialorder %s185_s20, 0.0 }
 0x1d1   :  { %202 = vrcp.f32 %v149_v12  ;;  %v161_v16 = vand.u32 2147483648, %v149_v12  ;;  %v159_v18 = vand.u32 2147483647, %v149_v12  ;;  %vm155_vm9 = vweird.f32 %v149_v12 }
 0x1d3   :  { %v162_v20 = vor.u32 1.1754944e-38, %v161_v16  ;;  %vm160_vm11 = vcmp.eq.f32.partialorder %v159_v18, 8.507059e+37 }
 0x1d7   :  { %v203_v13 = vpop.eup %202 }
 0x1d8   :  { %v151_v14 = vmul.f32 %v203_v13, %v149_v12  ;;  %vm156_vm8 = vweird.f32 %v203_v13 }
 0x1d9   :  { %vm157_vm10 = vmor %vm155_vm9, %vm156_vm8 }
 0x1da   :  { %v152_v15 = vsub.f32 1.0, %v151_v14 }
 0x1dc   :  { %v153_v17 = vmul.f32 %v203_v13, %v152_v15 }
 0x1de   :  { %v154_v19 = vadd.f32 %v203_v13, %v153_v17 }
 0x1e0   :  { %v158_v21 = vsel %vm157_vm10, %v203_v13, %v154_v19 }
 0x1e1   :  { %v163_v22 = vsel %vm160_vm11, %v162_v20, %v158_v21 }
 0x1e2   :  { %186 = vpush %v163_v22 }
 0x213   :  { %s187_s21 = spop %186 }
 0x214   :  { %s165_s22 = smul.f32 512.0, %s187_s21 }
 0x216   :  { %s274_s22 = smov (!%p148_p0, %s165_s22), 0.0 }
 0x217   :  { %v167_v23 = vstv %s274_s22 }
 0x218   :  { %v168_v24 = vmul.f32 %v167_v23, %v128_v52  ;;  %v169_v25 = vmul.f32 %v167_v23, %v129_v50  ;;  %v170_v26 = vmul.f32 %v167_v23, %v130_v61  ;;  %v171_v27 = vmul.f32 %v167_v23, %v131_v0 }
 0x21a   :  { %172 = vst.msk [vmem:[%s272_s2] sm:$0xff] %vm96_vm6, %v168_v24 }
 0x21b   :  { %173 = vst.msk [vmem:[%s272_s2 + $0x8] sm:$0xff] %vm96_vm6, %v169_v25 }
 0x21c   :  { %174 = vst.msk [vmem:[%s272_s2 + $0x10] sm:$0xff] %vm96_vm6, %v170_v26 }
 0x21d   :  { %175 = vst.msk [vmem:[%s272_s2 + $0x18] sm:$0xff] %vm96_vm6, %v171_v27 }

</bundles_post_ra>
